<compile_context>
chip_gen: v7x
topology: tpu7x:2x2x1
jax: 0.10.0
libtpu: 0.0.40
codegen_flags: <defaults>
</compile_context>

<pallas_src>
import functools

import jax
import jax.numpy as jnp
from jax.experimental import pallas as pl
from jax.experimental.pallas import tpu as pltpu


def _round_up(x, m):
    return ((x + m - 1) // m) * m


def gru_seq_kernel(x_ref, h0_ref, wxg_ref, whg_ref, whh_ref, wo_ref, b_ref,
                   out_ref, h_ref, *, H, O):
    """One (batch-tile, timestep) grid point of the GRU recurrence."""
    t = pl.program_id(1)

    # The final-hidden output block doubles as the VMEM-resident carry: its index_map
    # is constant along the T axis, so it stays in VMEM for the whole sequence of one
    # batch tile (accumulator pattern).
    @pl.when(t == 0)
    def _():
        h_ref[...] = h0_ref[...]

    x = x_ref[0]              # [TB, I]
    h = h_ref[...]            # [TB, H]  (f32 carry)
    cdt = wxg_ref.dtype       # matmul operand dtype (f32, or bf16 if enabled)

    # Fused gate pre-activations:
    #   gx = x @ [Wr_x | Wz_x | Wh_x] + [br | bz | bh]   -> [TB, 3H]
    #   gh = h @ [Wr_h | Wz_h]                           -> [TB, 2H]
    gx = jnp.dot(x.astype(cdt), wxg_ref[...],
                 preferred_element_type=jnp.float32) + b_ref[0:1, :3 * H]
    gh = jnp.dot(h.astype(cdt), whg_ref[...],
                 preferred_element_type=jnp.float32)

    # One sigmoid over the contiguous [TB, 2H] slab, then slice r / z.
    rz = jax.nn.sigmoid(gx[:, :2 * H] + gh)
    r = rz[:, :H]
    z = rz[:, H:]

    # h1 = tanh(x @ Wh_x + bh + (z*r) @ Wh_h); the x-part + bias already sit in gx[:, 2H:].
    h1 = jnp.tanh(gx[:, 2 * H:]
                  + jnp.dot((z * r).astype(cdt), whh_ref[...],
                            preferred_element_type=jnp.float32))

    # (1-z)*h + z*h1  ==  h + z*(h1 - h)
    h_new = h + z * (h1 - h)

    out = jax.nn.sigmoid(
        jnp.dot(h_new.astype(cdt), wo_ref[...],
                preferred_element_type=jnp.float32) + b_ref[1:2, :O])

    h_ref[...] = h_new
    out_ref[0] = out


def gru_forward_seq(xs, h0, params, *, use_bf16_matmul=False):
    """Run the GRU cell over a whole sequence inside ONE pallas_call.

    xs: [T, B, I], h0: [B, H] -> (outputs [T, B, O], h_final [B, H])
    """
    T, B, I = xs.shape
    H = h0.shape[1]
    O = params["w_o"].shape[1]

    # Batch tile: sublane-aligned; split into >=2 grid steps (two TensorCores on v7x)
    # only when each tile has enough work to beat the ~0.35 us per-grid-step overhead.
    if B >= 16 and H >= 128:
        TB = min(128, _round_up((B + 1) // 2, 8))
    else:
        TB = min(128, _round_up(B, 8))

    nb = pl.cdiv(B, TB)
    B_pad = nb * TB
    if B_pad != B:
        xs = jnp.pad(xs, ((0, 0), (0, B_pad - B), (0, 0)))
        h0 = jnp.pad(h0, ((0, B_pad - B), (0, 0)))

    w_xg, w_hg, w_hh, w_o = (params["w_xg"], params["w_hg"],
                             params["w_hh"], params["w_o"])
    if use_bf16_matmul:
        # bf16 MXU operands (native on v6e/v7x); accumulation + epilogue stay f32.
        # Note: relaxes bit-exactness vs. the f32 PyTorch reference.
        w_xg, w_hg, w_hh, w_o = (w.astype(jnp.bfloat16)
                                 for w in (w_xg, w_hg, w_hh, w_o))
    b_all = params["b_all"]
    wbytes = 2 if use_bf16_matmul else 4
    BW = b_all.shape[1]

    flops = 2 * T * B_pad * (I * 3 * H + H * 2 * H + H * H + H * O)
    transcendentals = T * B_pad * (3 * H + O)
    bytes_accessed = (4 * (T * B_pad * (I + O) + 2 * B_pad * H + 2 * BW)
                      + wbytes * (I * 3 * H + H * 2 * H + H * H + H * O))

    # VMEM guard: the pipeline double-buffers every operand even with a constant
    # index_map; keep an explicit limit so large H doesn't trip the default scoped
    # limit (16/32 MiB) long before physical VMEM is full.
    vmem_est = 2 * (4 * TB * (I + 2 * H + 2 * O)
                    + wbytes * (I * 3 * H + H * 2 * H + H * H + H * O)
                    + 4 * 2 * BW)
    vmem_limit = int(min(64 * 1024 * 1024, max(16 * 1024 * 1024, 2 * vmem_est)))

    kernel = functools.partial(gru_seq_kernel, H=H, O=O)

    outs, h_final = pl.pallas_call(
        kernel,
        out_shape=(jax.ShapeDtypeStruct((T, B_pad, O), jnp.float32),
                   jax.ShapeDtypeStruct((B_pad, H), jnp.float32)),
        grid=(nb, T),
        in_specs=[
            pl.BlockSpec((1, TB, I), lambda b, t: (t, b, 0)),    # x[t]
            pl.BlockSpec((TB, H), lambda b, t: (b, 0)),          # h0
            pl.BlockSpec((I, 3 * H), lambda b, t: (0, 0)),       # W_xg = [Wr_x|Wz_x|Wh_x]
            pl.BlockSpec((H, 2 * H), lambda b, t: (0, 0)),       # W_hg = [Wr_h|Wz_h]
            pl.BlockSpec((H, H), lambda b, t: (0, 0)),           # W_hh
            pl.BlockSpec((H, O), lambda b, t: (0, 0)),           # W_o
            pl.BlockSpec((2, BW), lambda b, t: (0, 0)),          # [b_g ; b_o]
        ],
        out_specs=(
            pl.BlockSpec((1, TB, O), lambda b, t: (t, b, 0)),    # per-step output
            pl.BlockSpec((TB, H), lambda b, t: (b, 0)),          # final hidden (carry)
        ),
        compiler_params=pltpu.CompilerParams(
            dimension_semantics=("parallel", "arbitrary"),
            vmem_limit_bytes=vmem_limit),
        cost_estimate=pl.CostEstimate(
            flops=flops,
            transcendentals=transcendentals,
            bytes_accessed=bytes_accessed),
    )(xs, h0, w_xg, w_hg, w_hh, w_o, b_all)

    if B_pad != B:
        outs = outs[:, :B]
        h_final = h_final[:B]
    return outs, h_final


def gru_forward(x, h, params, *, use_bf16_matmul=False):
    """Single GRU-cell step — exactly the PyTorch module's forward(x, h_state)."""
    outs, h_new = gru_forward_seq(x[None], h, params,
                                  use_bf16_matmul=use_bf16_matmul)
    return outs[0], h_new


def init_params(key, input_size, hidden_size, output_size):
    """nn.Linear-style U(-1/sqrt(fan_in), 1/sqrt(fan_in)) init, packed for the kernel."""
    ks = jax.random.split(key, 8)
    I, H, O = input_size, hidden_size, output_size
    fan_gate = I + H

    def uni(k, shape, fan):
        bound = 1.0 / jnp.sqrt(fan)
        return jax.random.uniform(k, shape, jnp.float32, -bound, bound)

    # PyTorch gate weights are [H, I+H]; split into x-/h-parts and transpose.
    wr = uni(ks[0], (H, fan_gate), fan_gate)
    wz = uni(ks[1], (H, fan_gate), fan_gate)
    wh = uni(ks[2], (H, fan_gate), fan_gate)
    wo = uni(ks[3], (O, H), H)
    br = uni(ks[4], (H,), fan_gate)
    bz = uni(ks[5], (H,), fan_gate)
    bh = uni(ks[6], (H,), fan_gate)
    bo = uni(ks[7], (O,), H)

    wr_x, wr_h = wr[:, :I].T, wr[:, I:].T
    wz_x, wz_h = wz[:, :I].T, wz[:, I:].T
    wh_x, wh_h = wh[:, :I].T, wh[:, I:].T

    BW = max(3 * H, O)
    b_all = jnp.zeros((2, BW), jnp.float32)
    b_all = b_all.at[0, :3 * H].set(jnp.concatenate([br, bz, bh]))
    b_all = b_all.at[1, :O].set(bo)

    return {
        "w_xg": jnp.concatenate([wr_x, wz_x, wh_x], axis=1),   # [I, 3H]
        "w_hg": jnp.concatenate([wr_h, wz_h], axis=1),         # [H, 2H]
        "w_hh": wh_h,                                          # [H, H]
        "w_o": wo.T,                                           # [H, O]
        "b_all": b_all,                                        # [2, max(3H, O)]
    }


def gru_cell_reference(x, h, p):
    """Pure-JAX reference mirroring the PyTorch forward exactly."""
    H = h.shape[1]
    O = p["w_o"].shape[1]
    wr_x, wz_x, wh_x = p["w_xg"][:, :H], p["w_xg"][:, H:2 * H], p["w_xg"][:, 2 * H:]
    wr_h, wz_h = p["w_hg"][:, :H], p["w_hg"][:, H:]
    br, bz, bh = p["b_all"][0, :H], p["b_all"][0, H:2 * H], p["b_all"][0, 2 * H:3 * H]
    bo = p["b_all"][1, :O]

    r = jax.nn.sigmoid(x @ wr_x + h @ wr_h + br)
    z = jax.nn.sigmoid(x @ wz_x + h @ wz_h + bz)
    h1 = jnp.tanh(x @ wh_x + (z * r) @ p["w_hh"] + bh)
    h_new = (1.0 - z) * h + h1 * z
    out = jax.nn.sigmoid(h_new @ p["w_o"] + bo)
    return out, h_new


def gru_seq_reference(xs, h0, p):
    h = h0
    outs = []
    for t in range(xs.shape[0]):
        out, h = gru_cell_reference(xs[t], h, p)
        outs.append(out)
    return jnp.stack(outs), h


if __name__ == "__main__":
    B, I, H, O, T = 8, 16, 32, 16, 8

    key = jax.random.PRNGKey(0)
    kx, kh, kp, ks = jax.random.split(key, 4)
    x = jax.random.normal(kx, (B, I), jnp.float32)
    h0 = jax.random.normal(kh, (B, H), jnp.float32)
    params = init_params(kp, I, H, O)

    # --- single step: exactly the PyTorch module's forward -------------------
    out, h_new = gru_forward(x, h0, params)
    out, h_new = jax.block_until_ready(out), jax.block_until_ready(h_new)
    ref_out, ref_h = gru_cell_reference(x, h0, params)
    assert jnp.allclose(out, ref_out, atol=1e-5, rtol=1e-5)
    assert jnp.allclose(h_new, ref_h, atol=1e-5, rtol=1e-5)

    # --- full sequence driven inside one kernel (recurrence hoisted) ---------
    xs = jax.random.normal(ks, (T, B, I), jnp.float32)
    outs, hT = gru_forward_seq(xs, h0, params)
    outs, hT = jax.block_until_ready(outs), jax.block_until_ready(hT)
    ref_outs, ref_hT = gru_seq_reference(xs, h0, params)
    assert jnp.allclose(outs, ref_outs, atol=1e-4, rtol=1e-4)
    assert jnp.allclose(hT, ref_hT, atol=1e-4, rtol=1e-4)

    print("KERNEL_OK")
</pallas_src>

<mosaic_0001>
module attributes {stable_mosaic.version = 11 : i64} {
  func.func @gru_seq_kernel(%arg0: i32, %arg1: i32, %arg2: memref<1x8x16xf32, #tpu.memory_space<vmem>>, %arg3: memref<8x32xf32, #tpu.memory_space<vmem>>, %arg4: memref<16x96xf32, #tpu.memory_space<vmem>>, %arg5: memref<32x64xf32, #tpu.memory_space<vmem>>, %arg6: memref<32x32xf32, #tpu.memory_space<vmem>>, %arg7: memref<32x16xf32, #tpu.memory_space<vmem>>, %arg8: memref<2x96xf32, #tpu.memory_space<vmem>>, %arg9: memref<1x8x16xf32, #tpu.memory_space<vmem>>, %arg10: memref<8x32xf32, #tpu.memory_space<vmem>>) attributes {dimension_semantics = [#tpu.dimension_semantics<parallel>, #tpu.dimension_semantics<arbitrary>], iteration_bounds = array<i64: 1, 1>, scalar_prefetch = 0 : i64, scratch_operands = 0 : i64, tpu.core_type = #tpu.core_type<tc>, window_params = [{transform_indices = @transform_0, window_bounds = array<i64: 1, 8, 16>}, {transform_indices = @transform_1, window_bounds = array<i64: 8, 32>}, {pipeline_mode = #tpu.pipeline_mode<synchronous>, transform_indices = @transform_2, window_bounds = array<i64: 16, 96>}, {pipeline_mode = #tpu.pipeline_mode<synchronous>, transform_indices = @transform_3, window_bounds = array<i64: 32, 64>}, {pipeline_mode = #tpu.pipeline_mode<synchronous>, transform_indices = @transform_4, window_bounds = array<i64: 32, 32>}, {pipeline_mode = #tpu.pipeline_mode<synchronous>, transform_indices = @transform_5, window_bounds = array<i64: 32, 16>}, {pipeline_mode = #tpu.pipeline_mode<synchronous>, transform_indices = @transform_6, window_bounds = array<i64: 2, 96>}, {transform_indices = @transform_7, window_bounds = array<i64: 1, 8, 16>}, {transform_indices = @transform_8, window_bounds = array<i64: 8, 32>}]} {
    %c0_i32 = arith.constant 0 : i32
    %0 = arith.cmpi eq, %arg1, %c0_i32 : i32
    %1 = arith.extui %0 : i1 to i32
    %c0_i32_0 = arith.constant 0 : i32
    %2 = arith.cmpi ne, %1, %c0_i32_0 : i32
    scf.if %2 {
      %c0_26 = arith.constant 0 : index
      %c0_27 = arith.constant 0 : index
      %45 = vector.load %arg3[%c0_26, %c0_27] : memref<8x32xf32, #tpu.memory_space<vmem>>, vector<8x32xf32>
      %c0_28 = arith.constant 0 : index
      %c0_29 = arith.constant 0 : index
      %46 = vector.load %arg10[%c0_28, %c0_29] : memref<8x32xf32, #tpu.memory_space<vmem>>, vector<8x32xf32>
      tpu.vector_store %arg10[%c0_28, %c0_29], %45 {strides = array<i32>} : memref<8x32xf32, #tpu.memory_space<vmem>>, vector<8x32xf32>,
    } else {
    }
    %c0 = arith.constant 0 : index
    %c0_1 = arith.constant 0 : index
    %c0_2 = arith.constant 0 : index
    %3 = vector.load %arg2[%c0, %c0_1, %c0_2] : memref<1x8x16xf32, #tpu.memory_space<vmem>>, vector<1x8x16xf32>
    %4 = vector.shape_cast %3 : vector<1x8x16xf32> to vector<8x16xf32>
    %c0_3 = arith.constant 0 : index
    %c0_4 = arith.constant 0 : index
    %5 = vector.load %arg10[%c0_3, %c0_4] : memref<8x32xf32, #tpu.memory_space<vmem>>, vector<8x32xf32>
    %c0_5 = arith.constant 0 : index
    %c0_6 = arith.constant 0 : index
    %6 = vector.load %arg4[%c0_5, %c0_6] : memref<16x96xf32, #tpu.memory_space<vmem>>, vector<16x96xf32>
    %cst = arith.constant dense<0.000000e+00> : vector<8x96xf32>
    %7 = tpu.matmul %4, %6, %cst {dimension_numbers = #tpu.dot_dimension_numbers<[1], [0], [0], [1], [0, 0, 1, 1], [], []>} : vector<8x16xf32>, vector<16x96xf32>, vector<8x96xf32> -> vector<8x96xf32>
    %c0_7 = arith.constant 0 : index
    %c0_8 = arith.constant 0 : index
    %8 = vector.load %arg8[%c0_7, %c0_8] : memref<2x96xf32, #tpu.memory_space<vmem>>, vector<1x96xf32>
    %9 = vector.broadcast %8 : vector<1x96xf32> to vector<8x96xf32>
    %10 = arith.addf %7, %9 : vector<8x96xf32>
    %c0_9 = arith.constant 0 : index
    %c0_10 = arith.constant 0 : index
    %11 = vector.load %arg5[%c0_9, %c0_10] : memref<32x64xf32, #tpu.memory_space<vmem>>, vector<32x64xf32>
    %cst_11 = arith.constant dense<0.000000e+00> : vector<8x64xf32>
    %12 = tpu.matmul %5, %11, %cst_11 {dimension_numbers = #tpu.dot_dimension_numbers<[1], [0], [0], [1], [0, 0, 1, 1], [], []>} : vector<8x32xf32>, vector<32x64xf32>, vector<8x64xf32> -> vector<8x64xf32>
    %13 = vector.extract_strided_slice %10 {offsets = [0, 0], sizes = [8, 64], strides = [1, 1]} : vector<8x96xf32> to vector<8x64xf32>
    %14 = arith.addf %13, %12 : vector<8x64xf32>
    %15 = arith.negf %14 : vector<8x64xf32>
    %16 = math.exp %15 : vector<8x64xf32>
    %cst_12 = arith.constant 1.000000e+00 : f32
    %17 = vector.broadcast %cst_12 : f32 to vector<8x64xf32>
    %18 = arith.addf %17, %16 : vector<8x64xf32>
    %19 = arith.divf %17, %18 : vector<8x64xf32>
    %20 = vector.extract_strided_slice %19 {offsets = [0, 0], sizes = [8, 32], strides = [1, 1]} : vector<8x64xf32> to vector<8x32xf32>
    %21 = vector.extract_strided_slice %19 {offsets = [0, 32], sizes = [8, 32], strides = [1, 1]} : vector<8x64xf32> to vector<8x32xf32>
    %22 = vector.extract_strided_slice %10 {offsets = [0, 64], sizes = [8, 32], strides = [1, 1]} : vector<8x96xf32> to vector<8x32xf32>
    %23 = arith.mulf %21, %20 : vector<8x32xf32>
    %c0_13 = arith.constant 0 : index
    %c0_14 = arith.constant 0 : index
    %24 = vector.load %arg6[%c0_13, %c0_14] : memref<32x32xf32, #tpu.memory_space<vmem>>, vector<32x32xf32>
    %cst_15 = arith.constant dense<0.000000e+00> : vector<8x32xf32>
    %25 = tpu.matmul %23, %24, %cst_15 {dimension_numbers = #tpu.dot_dimension_numbers<[1], [0], [0], [1], [0, 0, 1, 1], [], []>} : vector<8x32xf32>, vector<32x32xf32>, vector<8x32xf32> -> vector<8x32xf32>
    %26 = arith.addf %22, %25 : vector<8x32xf32>
    %27 = math.tanh %26 : vector<8x32xf32>
    %28 = arith.subf %27, %5 : vector<8x32xf32>
    %29 = arith.mulf %21, %28 : vector<8x32xf32>
    %30 = arith.addf %5, %29 : vector<8x32xf32>
    %c0_16 = arith.constant 0 : index
    %c0_17 = arith.constant 0 : index
    %31 = vector.load %arg7[%c0_16, %c0_17] : memref<32x16xf32, #tpu.memory_space<vmem>>, vector<32x16xf32>
    %cst_18 = arith.constant dense<0.000000e+00> : vector<8x16xf32>
    %32 = tpu.matmul %30, %31, %cst_18 {dimension_numbers = #tpu.dot_dimension_numbers<[1], [0], [0], [1], [0, 0, 1, 1], [], []>} : vector<8x32xf32>, vector<32x16xf32>, vector<8x16xf32> -> vector<8x16xf32>
    %c1 = arith.constant 1 : index
    %c0_19 = arith.constant 0 : index
    %33 = vector.load %arg8[%c1, %c0_19] : memref<2x96xf32, #tpu.memory_space<vmem>>, vector<1x16xf32>
    %34 = vector.broadcast %33 : vector<1x16xf32> to vector<8x16xf32>
    %35 = arith.addf %32, %34 : vector<8x16xf32>
    %36 = arith.negf %35 : vector<8x16xf32>
    %37 = math.exp %36 : vector<8x16xf32>
    %cst_20 = arith.constant 1.000000e+00 : f32
    %38 = vector.broadcast %cst_20 : f32 to vector<8x16xf32>
    %39 = arith.addf %38, %37 : vector<8x16xf32>
    %40 = arith.divf %38, %39 : vector<8x16xf32>
    %c0_21 = arith.constant 0 : index
    %c0_22 = arith.constant 0 : index
    %41 = vector.load %arg10[%c0_21, %c0_22] : memref<8x32xf32, #tpu.memory_space<vmem>>, vector<8x32xf32>
    tpu.vector_store %arg10[%c0_21, %c0_22], %30 {strides = array<i32>} : memref<8x32xf32, #tpu.memory_space<vmem>>, vector<8x32xf32>,
    %c0_23 = arith.constant 0 : index
    %c0_24 = arith.constant 0 : index
    %c0_25 = arith.constant 0 : index
    %42 = vector.load %arg9[%c0_23, %c0_24, %c0_25] : memref<1x8x16xf32, #tpu.memory_space<vmem>>, vector<1x8x16xf32>
    %43 = vector.shape_cast %42 : vector<1x8x16xf32> to vector<8x16xf32>
    %44 = vector.shape_cast %40 : vector<8x16xf32> to vector<1x8x16xf32>
    tpu.vector_store %arg9[%c0_23, %c0_24, %c0_25], %44 {strides = array<i32>} : memref<1x8x16xf32, #tpu.memory_space<vmem>>, vector<1x8x16xf32>,
    return
  }
  func.func @transform_0(%arg0: i32, %arg1: i32) -> (i32, i32, i32) {
    %c0_i32 = arith.constant 0 : i32
    %c0_i32_0 = arith.constant 0 : i32
    return %arg1, %arg0, %c0_i32 : i32, i32, i32
  }
  func.func @transform_1(%arg0: i32, %arg1: i32) -> (i32, i32) {
    %c0_i32 = arith.constant 0 : i32
    %c0_i32_0 = arith.constant 0 : i32
    return %arg0, %c0_i32 : i32, i32
  }
  func.func @transform_2(%arg0: i32, %arg1: i32) -> (i32, i32) {
    %c0_i32 = arith.constant 0 : i32
    %c0_i32_0 = arith.constant 0 : i32
    %c0_i32_1 = arith.constant 0 : i32
    return %c0_i32, %c0_i32_0 : i32, i32
  }
  func.func @transform_3(%arg0: i32, %arg1: i32) -> (i32, i32) {
    %c0_i32 = arith.constant 0 : i32
    %c0_i32_0 = arith.constant 0 : i32
    %c0_i32_1 = arith.constant 0 : i32
    return %c0_i32, %c0_i32_0 : i32, i32
  }
  func.func @transform_4(%arg0: i32, %arg1: i32) -> (i32, i32) {
    %c0_i32 = arith.constant 0 : i32
    %c0_i32_0 = arith.constant 0 : i32
    %c0_i32_1 = arith.constant 0 : i32
    return %c0_i32, %c0_i32_0 : i32, i32
  }
  func.func @transform_5(%arg0: i32, %arg1: i32) -> (i32, i32) {
    %c0_i32 = arith.constant 0 : i32
    %c0_i32_0 = arith.constant 0 : i32
    %c0_i32_1 = arith.constant 0 : i32
    return %c0_i32, %c0_i32_0 : i32, i32
  }
  func.func @transform_6(%arg0: i32, %arg1: i32) -> (i32, i32) {
    %c0_i32 = arith.constant 0 : i32
    %c0_i32_0 = arith.constant 0 : i32
    %c0_i32_1 = arith.constant 0 : i32
    return %c0_i32, %c0_i32_0 : i32, i32
  }
  func.func @transform_7(%arg0: i32, %arg1: i32) -> (i32, i32, i32) {
    %c0_i32 = arith.constant 0 : i32
    %c0_i32_0 = arith.constant 0 : i32
    return %arg1, %arg0, %c0_i32 : i32, i32, i32
  }
  func.func @transform_8(%arg0: i32, %arg1: i32) -> (i32, i32) {
    %c0_i32 = arith.constant 0 : i32
    %c0_i32_0 = arith.constant 0 : i32
    return %arg0, %c0_i32 : i32, i32
  }
}

</mosaic_0001>

<bundles_post_ra>
// kernel: tpu_custom_call.1
= control target key start
LH: loop header
LB: loop body
LE: loop exit
PB: predicated region body
PF: predicated region fallthrough
CT: control target
= control target key end

     0   :  { %14 = vsyncpa [#allocation3], 0  ;;  %s866_s0 = inlined_call_operand.hbm [shape: f32[1,8,16], index: 0, kind: input, shape index: {}]   ;;  %s867_s1 = inlined_call_operand.hbm [shape: f32[8,32], index: 1, kind: input, shape index: {}]   ;;  %s868_s2 = inlined_call_operand.vmem [shape: f32[16,96], index: 2, kind: input, shape index: {}]   ;;  %s869_s3 = inlined_call_operand.vmem [shape: f32[32,64], index: 3, kind: input, shape index: {}]   ;;  %s870_s4 = inlined_call_operand.hbm [shape: f32[32,32], index: 4, kind: input, shape index: {}]   ;;  %s871_s5 = inlined_call_operand.vmem [shape: f32[32,16], index: 5, kind: input, shape index: {}]   ;;  %s872_s6 = inlined_call_operand.vmem [shape: f32[2,96], index: 6, kind: input, shape index: {}]   ;;  %s873_s7 = inlined_call_operand.hbm [shape: f32[1,8,16], index: 7, kind: output, shape index: {0}]   ;;  %s874_s8 = inlined_call_operand.hbm [shape: f32[8,32], index: 8, kind: output, shape index: {1}]  }
   0x1   :  { %15 = vsyncpa [#allocation6], 0 }
   0x2   :  { %16 = vsyncpa [#allocation4], 0 }
   0x3   :  { %17 = vsyncpa [#allocation10], 0  ;;  %s694_s27 = smov [#allocation5]   ;;  %s695_s29 = smov [#allocation2]  }
   0x4   :  { %s34_s28 = sshll.u32 %s694_s27, 4  ;;  %s24_s30 = sshll.u32 %s695_s29, 4  ;;  %s35_s28 = int_to_ptr.vmem [resolvable:$true] %s34_s28  ;;  %s25_s30 = int_to_ptr.vmem [resolvable:$true] %s24_s30 }
   0x5   :  { %s576_s11 = scalar_lea.hbm %s867_s1, 128 }
   0x6   :  { %p577_p0 = scmp.ne.s32.totalorder %s867_s1, %s576_s11  ;;  %p580_p1 = scmp.lt.u32.totalorder %s576_s11, %s867_s1 }
   0x8   :  { %p582_p2 = pnand %p580_p1, %p577_p0 }
   0xa   :  { %585 = shalt.err (!%p582_p2)
}
   0xb   :  { %s586_s16 = scalar_lea.vmem %s35_s28, 128  ;;  %p591_p4 = scmp.lt.s32.totalorder %s35_s28, %s35_s28 }
   0xc   :  { %p587_p3 = scmp.ne.s32.totalorder %s35_s28, %s586_s16  ;;  %p592_p5 = scmp.lt.s32.totalorder %s586_s16, %s586_s16 }
   0xe   :  { %p593_p6 = por %p592_p5, %p591_p4 }
  0x10   :  { %p594_p7 = pnand %p593_p6, %p587_p3 }
  0x12   :  { %597 = shalt.err (!%p594_p7)
}
  0x13   :  { %37 = dma.hbm_to_vmem [thread:$0]  %s867_s1, 128, %s35_s28, [#allocation6]  }
  0x14   :  { %s598_s21 = scalar_lea.hbm %s866_s0, 128 }
  0x15   :  { %p599_p8 = scmp.ne.s32.totalorder %s866_s0, %s598_s21  ;;  %p602_p9 = scmp.lt.u32.totalorder %s598_s21, %s866_s0 }
  0x17   :  { %p604_p10 = pnand %p602_p9, %p599_p8 }
  0x19   :  { %607 = shalt.err (!%p604_p10)
}
  0x1a   :  { %s608_s26 = scalar_lea.vmem %s25_s30, 128  ;;  %p613_p12 = scmp.lt.s32.totalorder %s25_s30, %s25_s30 }
  0x1b   :  { %p609_p11 = scmp.ne.s32.totalorder %s25_s30, %s608_s26  ;;  %p614_p13 = scmp.lt.s32.totalorder %s608_s26, %s608_s26 }
  0x1d   :  { %p615_p0 = por %p614_p13, %p613_p12 }
  0x1f   :  { %p616_p1 = pnand %p615_p0, %p609_p11 }
  0x21   :  { %619 = shalt.err (!%p616_p1)
}
  0x22   :  { %27 = dma.hbm_to_vmem [thread:$0]  %s866_s0, 128, %s25_s30, [#allocation3]  }
  0x23   :  { %s696_s28 = smov [#allocation7]   ;;  %s620_s11 = scalar_lea.hbm %s870_s4, 512 }
  0x24   :  { %s47_s29 = sshll.u32 %s696_s28, 4  ;;  %p621_p2 = scmp.ne.s32.totalorder %s870_s4, %s620_s11  ;;  %s48_s29 = int_to_ptr.vmem [resolvable:$true] %s47_s29 }
  0x25   :  { %p624_p3 = scmp.lt.u32.totalorder %s620_s11, %s870_s4 }
  0x27   :  { %p626_p4 = pnand %p624_p3, %p621_p2 }
  0x29   :  { %629 = shalt.err (!%p626_p4)
}
  0x2a   :  { %s630_s16 = scalar_lea.vmem %s48_s29, 512  ;;  %p635_p6 = scmp.lt.s32.totalorder %s48_s29, %s48_s29 }
  0x2b   :  { %p631_p5 = scmp.ne.s32.totalorder %s48_s29, %s630_s16  ;;  %p636_p7 = scmp.lt.s32.totalorder %s630_s16, %s630_s16 }
  0x2d   :  { %p637_p8 = por %p636_p7, %p635_p6 }
  0x2f   :  { %p638_p9 = pnand %p637_p8, %p631_p5 }
  0x31   :  { %641 = shalt.err (!%p638_p9)
}
  0x32   :  { %s697_s0 = smov 128   ;;  %s698_s30 = smov 8  }
  0x33   :  { %53 = dma.hbm_to_vmem [thread:$0]  %s870_s4, 512, %s48_s29, [#allocation6], %s697_s0, %s697_s0, %s698_s30  }
  0x34   :  { %686 = dma.done.wait [#allocation3], 128  }
  0x35   :  { %687 = vsyncadd [#allocation3], 4294967168 }
  0x36   :  { %688 = dma.done.wait [#allocation6], 640  }
  0x37   :  { %689 = vsyncadd [#allocation6], 4294966656  ;;  %v699_v0 = vmov 0.0|0.0   ;;  %vm700_vm0 = vmmov 0   ;;  %v701_v1 = vmov 0.0   ;;  %v157_v2 = vld [vmem:[%s869_s3] sm:$0xff] }
  0x38   :  { %535 = vmatprep.subr.bf16.mxu1 %v699_v0  ;;  %532 = vmatprep.subr.bf16.mxu0 %v699_v0  ;;  %v158_v3 = vld [vmem:[%s869_s3 + $0x8] sm:$0xff]  ;;  %v76_v4 = vld [vmem:[%s868_s2] sm:$0xff]  ;;  %vm72_vm1 = vcmask 261120   ;;  %v159_v7 = vld [vmem:[%s869_s3 + $0x10] sm:$0xff]  ;;  %vm83_vm2 = vcmask 130048   ;;  %s702_s29 = smov 32  }
  0x39   :  { %496 = vmatprep.mubr.msk.f32.mxu0 %vm700_vm0, %v701_v1  ;;  %507 = vmatprep.mubr.msk.f32.mxu1 %vm700_vm0, %v701_v1  ;;  %v536_v5 = vpack.c.bf16 %v158_v3, %v157_v2  ;;  %v77_v6 = vld [vmem:[%s868_s2 + $0x8] sm:$0xff]  ;;  %v160_v9 = vld [vmem:[%s869_s3 + $0x18] sm:$0xff]  ;;  %v74_v12 = vld [vmem:[#allocation2] sm:$0xff]  ;;  %s703_s9 = smov 96   ;;  %s704_s10 = smov 64  }
  0x3a   :  { %v533_v8 = vpack.c.bf16 %v77_v6, %v76_v4  ;;  %v71_v10 = vld [vmem:[#allocation5] sm:$0xff]  ;;  %v539_v11 = vpack.c.bf16 %v160_v9, %v159_v7  ;;  %v466_v14 = vld [vmem:[%s872_s6] ss:$0 sm:$0xff]  ;;  %v247_v24 = vld [vmem:[#allocation7] sm:$0xff]  ;;  %s705_s17 = smov [#allocation9]  }
  0x3b   :  { %537 = vmatpush3.bf16.msra.mxu1 %v536_v5  ;;  %73 = vst.msk [vmem:[#allocation9] sm:$0xff] %vm72_vm1, %v71_v10  ;;  %v248_v25 = vld [vmem:[#allocation7 + $0x8] sm:$0xff]  ;;  %v249_v26 = vld [vmem:[#allocation7 + $0x10] sm:$0xff]  ;;  %v250_v28 = vld [vmem:[#allocation7 + $0x18] sm:$0xff] }
  0x3c   :  { %534 = vmatpush3.bf16.msra.mxu0 %v533_v8  ;;  %538 = vmatprep.subr.bf16.mxu1 %v699_v0  ;;  %v542_v27 = vpack.c.bf16 %v248_v25, %v247_v24  ;;  %v545_v29 = vpack.c.bf16 %v250_v28, %v249_v26  ;;  %v346_v38 = vld [vmem:[%s871_s5] sm:$0xff]  ;;  %v347_v39 = vld [vmem:[%s871_s5 + $0x8] sm:$0xff]  ;;  %v348_v40 = vld [vmem:[%s871_s5 + $0x10] sm:$0xff] }
  0x3d   :  { %541 = vmatprep.subr.bf16.mxu0 %v699_v0  ;;  %v548_v41 = vpack.c.bf16 %v347_v39, %v346_v38  ;;  %v349_v42 = vld [vmem:[%s871_s5 + $0x18] sm:$0xff]  ;;  %s452_s5 = sshll.u32 %s705_s17, 4  ;;  %s453_s5 = int_to_ptr.vmem [resolvable:$true] %s452_s5 }
  0x3e   :  { %v551_v43 = vpack.c.bf16 %v349_v42, %v348_v40  ;;  %s642_s18 = scalar_lea.vmem %s453_s5, 128  ;;  %p647_p11 = scmp.lt.s32.totalorder %s453_s5, %s453_s5 }
  0x3f   :  { %497 = vmatmul.mubr.msk.f32.vlgmr.msra.gmra.mrb[0].mxu0 %vm83_vm2, %v74_v12  ;;  %540 = vmatpush3.bf16.msra.mxu1 %v539_v11  ;;  %p643_p10 = scmp.ne.s32.totalorder %s453_s5, %s642_s18  ;;  %p648_p12 = scmp.lt.s32.totalorder %s642_s18, %s642_s18 }
  0x40   :  { %518 = vmatprep.mubr.msk.f32.mxu0 %vm700_vm0, %v701_v1  ;;  %547 = vmatprep.subr.bf16.mxu1 %v699_v0 }
  0x41   :  { %543 = vmatpush3.bf16.msra.mxu0 %v542_v27  ;;  %p649_p13 = por %p648_p12, %p647_p11 }
  0x42   :  { %v75_v13 = vld [vmem:[#allocation9] sm:$0xff]  ;;  %544 = vmatprep.subr.bf16.mxu0 %v699_v0 }
  0x43   :  { %508 = vmatmul.mubr.msk.f32.vlgmr.msra.gmra.mrb[0].mxu1 %vm72_vm1, %v75_v13  ;;  %p650_p0 = pnand %p649_p13, %p643_p10 }
  0x44   :  { %529 = vmatprep.mubr.msk.f32.mxu1 %vm700_vm0, %v701_v1  ;;  %549 = vmatpush3.bf16.msra.mxu1 %v548_v41 }
  0x45   :  { %546 = vmatpush3.bf16.msra.mxu0 %v545_v29  ;;  %550 = vmatprep.subr.bf16.mxu1 %v699_v0 }
  0x48   :  { %552 = vmatpush3.bf16.msra.mxu1 %v551_v43 }
 0x112   :  { %v153_v15 = vpop.f32.mrb[0].mxu0 }
 0x113   :  { %v154_v16 = vadd.f32 %v466_v14, %v153_v15  ;;  %v498_v17 = vpop.f32.mrb[1].mxu0 }
 0x116   :  { %v231_v18 = vpop.f32.mrb[0].mxu1 }
 0x117   :  { %v235_v19 = vadd.f32 %v231_v18, %v154_v16  ;;  %v509_v20 = vpop.f32.mrb[1].mxu1 }
 0x119   :  { %v469_v21 = vmul.f32 -1.442695, %v235_v19 }
 0x11b   :  { %566 = vpow2.f32 %v469_v21 }
 0x125   :  { %v567_v22 = vpop.eup %566 }
 0x126   :  { %v239_v23 = vadd.f32 1.0, %v567_v22 }
 0x128   :  { %568 = vrcp.f32 %v239_v23 }
 0x132   :  { %v569_v30 = vpop.eup %568 }
 0x133   :  { %243 = vrot.lane.b32.xlu0 %v569_v30, %s702_s29 }
 0x1a5   :  { %v244_v31 = vpop.permute.xlu0 %243 }
 0x1a6   :  { %v246_v32 = vmul.f32 %v569_v30, %v244_v31 }
 0x1a8   :  { %252 = vrot.lane.b32.xlu0 %v246_v32, %s703_s9 }
 0x21a   :  { %v253_v33 = vpop.permute.xlu0 %252 }
 0x21b   :  { %519 = vmatmul.mubr.msk.f32.vlgmr.msra.gmra.mrb[2].mxu0 %vm72_vm1, %v253_v33 }
 0x2ee   :  { %v322_v34 = vpop.f32.mrb[2].mxu0 }
 0x2ef   :  { %327 = vrot.lane.b32.xlu1 %v322_v34, %s704_s10  ;;  %v520_v35 = vpop.f32.mrb[3].mxu0 }
 0x2f3   :  { %332 = vrot.lane.b32.xlu1 %v75_v13, %s704_s10 }
 0x361   :  { %v328_v36 = vpop.permute.xlu1 %327 }
 0x362   :  { %v330_v37 = vadd.f32 %v328_v36, %v154_v16 }
 0x364   :  { %570 = vtanh.f32 %v330_v37 }
 0x365   :  { %v333_v44 = vpop.permute.xlu1 %332 }
 0x36e   :  { %v571_v45 = vpop.eup %570 }
 0x36f   :  { %v335_v46 = vsub.f32 %v571_v45, %v333_v44 }
 0x371   :  { %337 = vrot.lane.b32.xlu0 %v335_v46, %s703_s9 }
 0x3e3   :  { %v338_v47 = vpop.permute.xlu0 %337 }
 0x3e4   :  { %v340_v48 = vmul.f32 %v569_v30, %v338_v47 }
 0x3e6   :  { %342 = vrot.lane.b32.xlu1 %v340_v48, %s703_s9 }
 0x458   :  { %v343_v49 = vpop.permute.xlu1 %342 }
 0x459   :  { %v345_v50 = vadd.f32 %v343_v49, %v75_v13 }
 0x45b   :  { %434 = vst.msk [vmem:[#allocation9] sm:$0xff] %vm72_vm1, %v345_v50  ;;  %530 = vmatmul.mubr.msk.f32.vlgmr.msra.gmra.mrb[2].mxu1 %vm72_vm1, %v345_v50 }
 0x45c   :  { %653 = shalt.err (!%p650_p0)
}
 0x45d   :  { %s654_s4 = scalar_lea.hbm %s874_s8, 128 }
 0x45e   :  { %p655_p1 = scmp.ne.s32.totalorder %s874_s8, %s654_s4  ;;  %p658_p2 = scmp.lt.u32.totalorder %s654_s4, %s874_s8 }
 0x460   :  { %p660_p3 = pnand %p658_p2, %p655_p1 }
 0x462   :  { %663 = shalt.err (!%p660_p3)
}
 0x463   :  { %455 = dma.vmem_to_hbm [thread:$0]  %s453_s5, 128, %s874_s8, [#allocation10]   ;;  %v471_v51 = vld [vmem:[%s872_s6 + $0x1] ss:$0 sm:$0xff] }
 0x464   :  { %s706_s28 = smov [#allocation8]  }
 0x465   :  { %s442_s2 = sshll.u32 %s706_s28, 4  ;;  %s443_s2 = int_to_ptr.vmem [resolvable:$true] %s442_s2 }
 0x466   :  { %s664_s3 = scalar_lea.vmem %s443_s2, 128  ;;  %p669_p5 = scmp.lt.s32.totalorder %s443_s2, %s443_s2 }
 0x467   :  { %p665_p4 = scmp.ne.s32.totalorder %s443_s2, %s664_s3  ;;  %p670_p6 = scmp.lt.s32.totalorder %s664_s3, %s664_s3 }
 0x469   :  { %p671_p7 = por %p670_p6, %p669_p5 }
 0x46b   :  { %p672_p8 = pnand %p671_p7, %p665_p4 }
 0x52e   :  { %v424_v52 = vpop.f32.mrb[2].mxu1 }
 0x52f   :  { %v425_v53 = vadd.f32 %v471_v51, %v424_v52  ;;  %v531_v54 = vpop.f32.mrb[3].mxu1 }
 0x531   :  { %v473_v55 = vmul.f32 -1.442695, %v425_v53 }
 0x533   :  { %572 = vpow2.f32 %v473_v55 }
 0x53d   :  { %v573_v56 = vpop.eup %572 }
 0x53e   :  { %v431_v57 = vadd.f32 1.0, %v573_v56 }
 0x540   :  { %574 = vrcp.f32 %v431_v57 }
 0x54a   :  { %v575_v58 = vpop.eup %574 }
 0x54b   :  { %435 = vst.msk [vmem:[#allocation8] sm:$0xff] %vm83_vm2, %v575_v58 }
 0x54c   :  { %675 = shalt.err (!%p672_p8)
}
 0x54d   :  { %s676_s29 = scalar_lea.hbm %s873_s7, 128 }
 0x54e   :  { %p677_p9 = scmp.ne.s32.totalorder %s873_s7, %s676_s29  ;;  %p680_p10 = scmp.lt.u32.totalorder %s676_s29, %s873_s7 }
 0x550   :  { %p682_p11 = pnand %p680_p10, %p677_p9 }
 0x552   :  { %685 = shalt.err (!%p682_p11)
}
 0x553   :  { %445 = dma.vmem_to_hbm [thread:$0]  %s443_s2, 128, %s873_s7, [#allocation4]  }
 0x554   :  { %690 = dma.done.wait [#allocation4], 128  }
 0x555   :  { %691 = vsyncadd [#allocation4], 4294967168 }
 0x556   :  { %692 = dma.done.wait [#allocation10], 128  }
 0x557   :  { %693 = vsyncadd [#allocation10], 4294967168 }
 0x558   :  { %462 = vsyncpa [#allocation3], 1 }
 0x559   :  { %463 = vsyncpa [#allocation6], 1 }
 0x55a   :  { %464 = vsyncpa [#allocation4], 1 }
 0x55b   :  { %465 = vsyncpa [#allocation10], 1 }

</bundles_post_ra>
